<compile_context>
chip_gen: v6e
topology: v6e:2x2x1
jax: 0.10.0
libtpu: 0.0.40
codegen_flags: <defaults>
</compile_context>

<pallas_src>
import math

import jax
import jax.numpy as jnp
from jax import lax
from jax.experimental import pallas as pl
from jax.experimental.pallas import tpu as pltpu


def _round_up(a: int, b: int) -> int:
    return (a + b - 1) // b * b


def graph_filter_kernel(h_ref, x_ref, s_ref, y_ref):
    """One batch tile: y = sum_{k=0}^{K-1} h[k] * (x @ S^k).

    h_ref: SMEM [K]            filter taps (f32)
    x_ref: VMEM [TB, N_pad]    input tile (f32)
    s_ref: VMEM [N_pad, N_pad] GSO, resident across the grid (f32 or bf16)
    y_ref: VMEM [TB, N_pad]    output tile (f32)
    """
    S = s_ref[...]                              # stored dtype (f32 or bf16)
    x = x_ref[...].astype(jnp.float32)
    K = h_ref.shape[0]                          # static

    y = h_ref[0] * x                            # k = 0 term
    cur = x

    def step(k, y, cur):
        # MXU matmul (f32 accumulation) + VPU tap accumulate (free under the MXU).
        cur = jnp.dot(cur.astype(S.dtype), S, preferred_element_type=jnp.float32)
        y = y + h_ref[k] * cur
        return y, cur

    if K <= 8:
        # Small K: static unroll, LLO co-issues the VPU adds under the matmuls.
        for k in range(1, K):
            y, cur = step(k, y, cur)
    else:
        # Large K: visible loop bounds the live ranges of the two f32 accumulators.
        def body(k, carry):
            y, cur = carry
            return step(k, *carry[::-1][::-1]) if False else step(k, y, cur)

        y, cur = lax.fori_loop(1, K, lambda k, c: step(k, c[0], c[1]), (y, cur),
                               unroll=True)

    y_ref[...] = y.astype(y_ref.dtype)


def graph_filter(h, S, x, *, batch_tile=None, s_dtype=jnp.float32):
    """Pallas wrapper. h: [K], S: [N, N], x: [B, N] -> y: [B, N] (f32)."""
    B, N = x.shape
    K = h.shape[0]

    # Lane-dense padding: nodes to a multiple of 128 (MXU / unmasked vst).
    N_pad = max(128, _round_up(N, 128))

    # Batch tile: fill the MXU M-dimension when B is large; otherwise round to sublanes.
    if batch_tile is None:
        batch_tile = 256 if B >= 256 else (128 if B >= 128 else B)
    TB = _round_up(min(batch_tile, max(B, 1)), 8)
    B_pad = _round_up(B, TB)

    # Zero padding is exact: padded x columns are zero and padded S rows/cols are zero,
    # so padded nodes never feed back into real nodes.
    x_p = jnp.pad(x.astype(jnp.float32), ((0, B_pad - B), (0, N_pad - N)))
    S_p = jnp.pad(S.astype(jnp.float32), ((0, N_pad - N), (0, N_pad - N))).astype(s_dtype)
    h_f = h.astype(jnp.float32)

    grid = (B_pad // TB,)

    # VMEM budget: resident S + double-buffered x and y tiles + headroom.
    s_bytes = N_pad * N_pad * jnp.dtype(s_dtype).itemsize
    xy_bytes = 2 * 2 * TB * N_pad * 4
    vmem_limit = int(min(max(s_bytes + xy_bytes + (8 << 20), 16 << 20), 100 << 20))

    cost = pl.CostEstimate(
        flops=2 * B_pad * N_pad * N_pad * max(K - 1, 0),
        transcendentals=0,
        bytes_accessed=2 * B_pad * N_pad * 4 + s_bytes + K * 4,
    )

    y_p = pl.pallas_call(
        graph_filter_kernel,
        out_shape=jax.ShapeDtypeStruct((B_pad, N_pad), jnp.float32),
        grid=grid,
        in_specs=[
            pl.BlockSpec(memory_space=pltpu.MemorySpace.SMEM),        # h (scalar taps)
            pl.BlockSpec((TB, N_pad), lambda i: (i, 0)),              # x tile (pipelined)
            pl.BlockSpec((N_pad, N_pad), lambda i: (0, 0)),           # S (VMEM-resident)
        ],
        out_specs=pl.BlockSpec((TB, N_pad), lambda i: (i, 0)),        # y tile
        compiler_params=pltpu.CompilerParams(
            dimension_semantics=("parallel",),
            vmem_limit_bytes=vmem_limit,
        ),
        cost_estimate=cost,
    )(h_f, x_p, S_p)

    return y_p[:B, :N]


def graph_filter_ref(h, S, x):
    """Pure-JAX reference mirroring FilterFunction exactly."""
    K = h.shape[0]
    B, N = x.shape
    xk = x.reshape(B, 1, N)
    z = xk
    for _ in range(1, K):
        xk = jnp.matmul(xk, S.reshape(1, N, N))
        z = jnp.concatenate((z, xk), axis=1)
    y = jnp.matmul(jnp.transpose(z, (0, 2, 1)), h)   # [B, N, K] @ [K] -> [B, N]
    return y


if __name__ == "__main__":
    key = jax.random.PRNGKey(0)
    k_gso, k_w, k_x = jax.random.split(key, 3)

    # --- Test 1: module-sized shapes (B=8, N=16, K=3), f32 S, single batch tile ---
    B, N, K = 8, 16, 3
    gso = jax.random.normal(k_gso, (N, N), dtype=jnp.float32)
    gso = 0.5 * (gso + gso.T)
    stdv = 1.0 / math.sqrt(K)
    weight = jax.random.uniform(k_w, (K,), minval=-stdv, maxval=stdv, dtype=jnp.float32)
    x = jax.random.normal(k_x, (B, N), dtype=jnp.float32)

    y = jax.block_until_ready(graph_filter(weight, gso, x))
    y_ref = graph_filter_ref(weight, gso, x)
    assert y.shape == (B, N)
    assert jnp.allclose(y, y_ref, atol=1e-4, rtol=1e-4), "mismatch vs reference (test 1)"

    # --- Test 2: multiple batch tiles (grid > 1) and large K (fori_loop path) ---
    B2, K2 = 24, 9
    stdv2 = 1.0 / math.sqrt(K2)
    weight2 = jax.random.uniform(k_w, (K2,), minval=-stdv2, maxval=stdv2,
                                 dtype=jnp.float32)
    x2 = jax.random.normal(k_x, (B2, N), dtype=jnp.float32)
    # Scale GSO so high powers stay well-conditioned numerically.
    gso2 = gso / (jnp.max(jnp.abs(gso)) * N)

    y2 = jax.block_until_ready(graph_filter(weight2, gso2, x2, batch_tile=8))
    y2_ref = graph_filter_ref(weight2, gso2, x2)
    assert y2.shape == (B2, N)
    assert jnp.allclose(y2, y2_ref, atol=1e-4, rtol=1e-4), "mismatch vs reference (test 2)"

    # --- Test 3: bf16-stored S (v6e/v7x fast path), f32 accumulation, looser tolerance ---
    y3 = jax.block_until_ready(graph_filter(weight, gso, x, s_dtype=jnp.bfloat16))
    assert jnp.allclose(y3, y_ref, atol=5e-2, rtol=5e-2), "mismatch vs reference (test 3)"

    print("KERNEL_OK")
</pallas_src>

<mosaic_0001>
module attributes {stable_mosaic.version = 11 : i64} {
  func.func @graph_filter_kernel(%arg0: i32, %arg1: memref<3xf32, #tpu.memory_space<smem>>, %arg2: memref<8x128xf32, #tpu.memory_space<vmem>>, %arg3: memref<128x128xf32, #tpu.memory_space<vmem>>, %arg4: memref<8x128xf32, #tpu.memory_space<vmem>>) attributes {dimension_semantics = [#tpu.dimension_semantics<parallel>], iteration_bounds = array<i64: 1>, scalar_prefetch = 0 : i64, scratch_operands = 0 : i64, tpu.core_type = #tpu.core_type<tc>, window_params = [{transform_indices = @transform_0, window_bounds = array<i64: 3>}, {transform_indices = @transform_1, window_bounds = array<i64: 8, 128>}, {pipeline_mode = #tpu.pipeline_mode<synchronous>, transform_indices = @transform_2, window_bounds = array<i64: 128, 128>}, {transform_indices = @transform_3, window_bounds = array<i64: 8, 128>}]} {
    %c0 = arith.constant 0 : index
    %c0_0 = arith.constant 0 : index
    %0 = vector.load %arg3[%c0, %c0_0] : memref<128x128xf32, #tpu.memory_space<vmem>>, vector<128x128xf32>
    %c0_1 = arith.constant 0 : index
    %c0_2 = arith.constant 0 : index
    %1 = vector.load %arg2[%c0_1, %c0_2] : memref<8x128xf32, #tpu.memory_space<vmem>>, vector<8x128xf32>
    %c0_3 = arith.constant 0 : index
    %2 = memref.load %arg1[%c0_3] : memref<3xf32, #tpu.memory_space<smem>>
    %3 = vector.broadcast %2 : f32 to vector<8x128xf32>
    %4 = arith.mulf %3, %1 : vector<8x128xf32>
    %cst = arith.constant dense<0.000000e+00> : vector<8x128xf32>
    %5 = tpu.matmul %1, %0, %cst {dimension_numbers = #tpu.dot_dimension_numbers<[1], [0], [0], [1], [0, 0, 1, 1], [], []>} : vector<8x128xf32>, vector<128x128xf32>, vector<8x128xf32> -> vector<8x128xf32>
    %c1 = arith.constant 1 : index
    %6 = memref.load %arg1[%c1] : memref<3xf32, #tpu.memory_space<smem>>
    %7 = vector.broadcast %6 : f32 to vector<8x128xf32>
    %8 = arith.mulf %7, %5 : vector<8x128xf32>
    %9 = arith.addf %4, %8 : vector<8x128xf32>
    %cst_4 = arith.constant dense<0.000000e+00> : vector<8x128xf32>
    %10 = tpu.matmul %5, %0, %cst_4 {dimension_numbers = #tpu.dot_dimension_numbers<[1], [0], [0], [1], [0, 0, 1, 1], [], []>} : vector<8x128xf32>, vector<128x128xf32>, vector<8x128xf32> -> vector<8x128xf32>
    %c2 = arith.constant 2 : index
    %11 = memref.load %arg1[%c2] : memref<3xf32, #tpu.memory_space<smem>>
    %12 = vector.broadcast %11 : f32 to vector<8x128xf32>
    %13 = arith.mulf %12, %10 : vector<8x128xf32>
    %14 = arith.addf %9, %13 : vector<8x128xf32>
    %c0_5 = arith.constant 0 : index
    %c0_6 = arith.constant 0 : index
    %15 = vector.load %arg4[%c0_5, %c0_6] : memref<8x128xf32, #tpu.memory_space<vmem>>, vector<8x128xf32>
    tpu.vector_store %arg4[%c0_5, %c0_6], %14 {strides = array<i32>} : memref<8x128xf32, #tpu.memory_space<vmem>>, vector<8x128xf32>,
    return
  }
  func.func @transform_0(%arg0: i32) -> i32 {
    %c0_i32 = arith.constant 0 : i32
    %c0_i32_0 = arith.constant 0 : i32
    return %c0_i32 : i32
  }
  func.func @transform_1(%arg0: i32) -> (i32, i32) {
    %c0_i32 = arith.constant 0 : i32
    %c0_i32_0 = arith.constant 0 : i32
    return %arg0, %c0_i32 : i32, i32
  }
  func.func @transform_2(%arg0: i32) -> (i32, i32) {
    %c0_i32 = arith.constant 0 : i32
    %c0_i32_0 = arith.constant 0 : i32
    %c0_i32_1 = arith.constant 0 : i32
    return %c0_i32, %c0_i32_0 : i32, i32
  }
  func.func @transform_3(%arg0: i32) -> (i32, i32) {
    %c0_i32 = arith.constant 0 : i32
    %c0_i32_0 = arith.constant 0 : i32
    return %arg0, %c0_i32 : i32, i32
  }
}

</mosaic_0001>

<bundles_post_ra>
// kernel: tpu_custom_call.1
= control target key start
LH: loop header
LB: loop body
LE: loop exit
PB: predicated region body
PF: predicated region fallthrough
CT: control target
= control target key end

     0   :  { %8 = vsyncpa [#allocation5], 0  ;;  %s504_s0 = inlined_call_operand.hbm [shape: f32[3], index: 0, kind: input, shape index: {}]   ;;  %s505_s1 = inlined_call_operand.hbm [shape: f32[8,128], index: 1, kind: input, shape index: {}]   ;;  %s506_s2 = inlined_call_operand.hbm [shape: f32[128,128], index: 2, kind: input, shape index: {}]   ;;  %s507_s3 = inlined_call_operand.hbm [shape: f32[8,128], index: 3, kind: output, shape index: {}]  }
   0x1   :  { %9 = vsyncpa [#allocation3], 0 }
   0x2   :  { %10 = vsyncpa [#allocation8], 0 }
   0x3   :  { %11 = vsyncpa [#allocation4], 0  ;;  %s428_s12 = smov [#allocation2]   ;;  %s429_s15 = smov [#allocation6]  }
   0x4   :  { %19 = dma.hbm_to_smem %s504_s0, 16, %s428_s12, [#allocation5]  }
   0x5   :  { %s26_s16 = sshll.u32 %s429_s15, 4  ;;  %s430_s17 = smov [#allocation7]   ;;  %s27_s16 = int_to_ptr.vmem [resolvable:$true] %s26_s16 }
   0x6   :  { %s35_s18 = sshll.u32 %s430_s17, 4  ;;  %s368_s19 = scalar_lea.vmem %s27_s16, 128  ;;  %s36_s18 = int_to_ptr.vmem [resolvable:$true] %s35_s18 }
   0x7   :  { %p369_p0 = scmp.ne.s32.totalorder %s27_s16, %s368_s19  ;;  %p373_p1 = scmp.lt.s32.totalorder %s27_s16, %s27_s16 }
   0x8   :  { %p374_p2 = scmp.lt.s32.totalorder %s368_s19, %s368_s19 }
   0xa   :  { %p375_p3 = por %p374_p2, %p373_p1 }
   0xc   :  { %p376_p4 = pnand %p375_p3, %p369_p0 }
   0xe   :  { %379 = shalt.err (!%p376_p4)
}
   0xf   :  { %29 = dma.hbm_to_vmem [thread:$0]  %s505_s1, 128, %s27_s16, [#allocation3]  }
  0x10   :  { %s388_s22 = scalar_lea.vmem %s36_s18, 2048  ;;  %p393_p6 = scmp.lt.s32.totalorder %s36_s18, %s36_s18 }
  0x11   :  { %p389_p5 = scmp.ne.s32.totalorder %s36_s18, %s388_s22  ;;  %p394_p7 = scmp.lt.s32.totalorder %s388_s22, %s388_s22 }
  0x13   :  { %p395_p8 = por %p394_p7, %p393_p6 }
  0x15   :  { %p396_p9 = pnand %p395_p8, %p389_p5 }
  0x17   :  { %399 = shalt.err (!%p396_p9)
}
  0x18   :  { %s431_s0 = smov 128   ;;  %s432_s23 = smov 8  }
  0x19   :  { %41 = dma.hbm_to_vmem [thread:$0]  %s506_s2, 2048, %s36_s18, [#allocation8], %s431_s0, %s431_s0, %s432_s23  }
  0x1a   :  { %420 = dma.done.wait [#allocation5], 16  }
  0x1b   :  { %421 = vsyncadd [#allocation5], 4294967280 }
  0x1c   :  { %422 = dma.done.wait [#allocation3], 128  }
  0x1d   :  { %423 = vsyncadd [#allocation3], 4294967168 }
  0x1e   :  { %424 = dma.done.wait [#allocation8], 2048  }
  0x1f   :  { %425 = vsyncadd [#allocation8], 4294965248 }
  0x20   :  { %51 = sfence }
  0x21   :  { %v67_v0 = vld [vmem:[#allocation7 + $0x78] sm:$0xff]  ;;  %v433_v1 = vmov 0.0   ;;  %v66_v2 = vld [vmem:[#allocation7 + $0x70] sm:$0xff]  ;;  %vm434_vm0 = vmmov 0   ;;  %v65_v3 = vld [vmem:[#allocation7 + $0x68] sm:$0xff]  ;;  %s69_s1 = sld [smem:[#allocation2]] }
  0x22   :  { %274 = vmatprep.subr.mxu0 %v433_v1  ;;  %306 = vmatprep.mubr.msk.f32.mxu0 %vm434_vm0, %v433_v1  ;;  %v64_v4 = vld [vmem:[#allocation7 + $0x60] sm:$0xff]  ;;  %v63_v5 = vld [vmem:[#allocation7 + $0x58] sm:$0xff]  ;;  %v62_v6 = vld [vmem:[#allocation7 + $0x50] sm:$0xff]  ;;  %s238_s2 = sld [smem:[#allocation2 + $0x1]]  ;;  %s435_s27 = smov [#allocation9]  }
  0x23   :  { %275 = vmatpush3.msra.mxu0 %v67_v0  ;;  %309 = vmatprep.subr.mxu1 %v433_v1  ;;  %v61_v7 = vld [vmem:[#allocation7 + $0x48] sm:$0xff]  ;;  %v60_v8 = vld [vmem:[#allocation7 + $0x40] sm:$0xff]  ;;  %v59_v9 = vld [vmem:[#allocation7 + $0x38] sm:$0xff]  ;;  %s239_s26 = sld [smem:[#allocation2 + $0x2]]  ;;  %s227_s28 = sshll.u32 %s435_s27, 4  ;;  %s228_s28 = int_to_ptr.vmem [resolvable:$true] %s227_s28 }
  0x24   :  { %276 = vmatprep.subr.mxu0 %v433_v1  ;;  %310 = vmatpush3.msra.mxu1 %v67_v0  ;;  %v58_v10 = vld [vmem:[#allocation7 + $0x30] sm:$0xff]  ;;  %v57_v11 = vld [vmem:[#allocation7 + $0x28] sm:$0xff]  ;;  %v56_v12 = vld [vmem:[#allocation7 + $0x20] sm:$0xff]  ;;  %s400_s29 = scalar_lea.vmem %s228_s28, 128  ;;  %p405_p11 = scmp.lt.s32.totalorder %s228_s28, %s228_s28 }
  0x25   :  { %277 = vmatpush3.msra.mxu0 %v66_v2  ;;  %311 = vmatprep.subr.mxu1 %v433_v1  ;;  %v55_v13 = vld [vmem:[#allocation7 + $0x18] sm:$0xff]  ;;  %v54_v14 = vld [vmem:[#allocation7 + $0x10] sm:$0xff]  ;;  %v53_v15 = vld [vmem:[#allocation7 + $0x8] sm:$0xff]  ;;  %p401_p10 = scmp.ne.s32.totalorder %s228_s28, %s400_s29  ;;  %p406_p12 = scmp.lt.s32.totalorder %s400_s29, %s400_s29 }
  0x26   :  { %278 = vmatprep.subr.mxu0 %v433_v1  ;;  %312 = vmatpush3.msra.mxu1 %v66_v2  ;;  %v52_v16 = vld [vmem:[#allocation7] sm:$0xff]  ;;  %v68_v17 = vld [vmem:[#allocation6] sm:$0xff] }
  0x27   :  { %279 = vmatpush3.msra.mxu0 %v65_v3  ;;  %313 = vmatprep.subr.mxu1 %v433_v1  ;;  %v70_v18 = vstv %s69_s1  ;;  %p407_p13 = por %p406_p12, %p405_p11 }
  0x28   :  { %280 = vmatprep.subr.mxu0 %v433_v1  ;;  %314 = vmatpush3.msra.mxu1 %v65_v3  ;;  %v143_v19 = vstv %s238_s2  ;;  %v71_v20 = vmul.f32 %v70_v18, %v68_v17 }
  0x29   :  { %281 = vmatpush3.msra.mxu0 %v64_v4  ;;  %315 = vmatprep.subr.mxu1 %v433_v1  ;;  %v217_v25 = vstv %s239_s26  ;;  %p408_p0 = pnand %p407_p13, %p401_p10 }
  0x2a   :  { %282 = vmatprep.subr.mxu0 %v433_v1  ;;  %316 = vmatpush3.msra.mxu1 %v64_v4 }
  0x2b   :  { %283 = vmatpush3.msra.mxu0 %v63_v5  ;;  %317 = vmatprep.subr.mxu1 %v433_v1 }
  0x2c   :  { %284 = vmatprep.subr.mxu0 %v433_v1  ;;  %318 = vmatpush3.msra.mxu1 %v63_v5 }
  0x2d   :  { %285 = vmatpush3.msra.mxu0 %v62_v6  ;;  %319 = vmatprep.subr.mxu1 %v433_v1 }
  0x2e   :  { %286 = vmatprep.subr.mxu0 %v433_v1  ;;  %320 = vmatpush3.msra.mxu1 %v62_v6 }
  0x2f   :  { %287 = vmatpush3.msra.mxu0 %v61_v7  ;;  %321 = vmatprep.subr.mxu1 %v433_v1 }
  0x30   :  { %288 = vmatprep.subr.mxu0 %v433_v1  ;;  %322 = vmatpush3.msra.mxu1 %v61_v7 }
  0x31   :  { %289 = vmatpush3.msra.mxu0 %v60_v8  ;;  %323 = vmatprep.subr.mxu1 %v433_v1 }
  0x32   :  { %290 = vmatprep.subr.mxu0 %v433_v1  ;;  %324 = vmatpush3.msra.mxu1 %v60_v8 }
  0x33   :  { %291 = vmatpush3.msra.mxu0 %v59_v9  ;;  %325 = vmatprep.subr.mxu1 %v433_v1 }
  0x34   :  { %292 = vmatprep.subr.mxu0 %v433_v1  ;;  %326 = vmatpush3.msra.mxu1 %v59_v9 }
  0x35   :  { %293 = vmatpush3.msra.mxu0 %v58_v10  ;;  %327 = vmatprep.subr.mxu1 %v433_v1 }
  0x36   :  { %294 = vmatprep.subr.mxu0 %v433_v1  ;;  %328 = vmatpush3.msra.mxu1 %v58_v10 }
  0x37   :  { %295 = vmatpush3.msra.mxu0 %v57_v11  ;;  %329 = vmatprep.subr.mxu1 %v433_v1 }
  0x38   :  { %296 = vmatprep.subr.mxu0 %v433_v1  ;;  %330 = vmatpush3.msra.mxu1 %v57_v11 }
  0x39   :  { %297 = vmatpush3.msra.mxu0 %v56_v12  ;;  %331 = vmatprep.subr.mxu1 %v433_v1 }
  0x3a   :  { %298 = vmatprep.subr.mxu0 %v433_v1  ;;  %332 = vmatpush3.msra.mxu1 %v56_v12 }
  0x3b   :  { %299 = vmatpush3.msra.mxu0 %v55_v13  ;;  %333 = vmatprep.subr.mxu1 %v433_v1 }
  0x3c   :  { %300 = vmatprep.subr.mxu0 %v433_v1  ;;  %334 = vmatpush3.msra.mxu1 %v55_v13 }
  0x3d   :  { %301 = vmatpush3.msra.mxu0 %v54_v14  ;;  %335 = vmatprep.subr.mxu1 %v433_v1 }
  0x3e   :  { %302 = vmatprep.subr.mxu0 %v433_v1  ;;  %336 = vmatpush3.msra.mxu1 %v54_v14 }
  0x3f   :  { %303 = vmatpush3.msra.mxu0 %v53_v15  ;;  %337 = vmatprep.subr.mxu1 %v433_v1 }
  0x40   :  { %304 = vmatprep.subr.mxu0 %v433_v1  ;;  %338 = vmatpush3.msra.mxu1 %v53_v15 }
  0x41   :  { %305 = vmatpush3.msra.mxu0 %v52_v16  ;;  %339 = vmatprep.subr.mxu1 %v433_v1 }
  0x42   :  { %307 = vmatmul.mubr.f32.vlgmr.msra.gmra.mxu0 %v68_v17  ;;  %340 = vmatpush3.msra.mxu1 %v52_v16 }
  0x43   :  { %341 = vmatprep.mubr.msk.f32.mxu1 %vm434_vm0, %v433_v1 }
 0x102   :  { %v138_v21 = vpop.f32.mrf.mxu0 }
 0x103   :  { %v144_v22 = vmul.f32 %v143_v19, %v138_v21  ;;  %342 = vmatmul.mubr.f32.vlgmr.msra.gmra.mxu1 %v138_v21 }
 0x104   :  { %v308_v23 = vpop.f32.mrf.mxu0 }
 0x105   :  { %v145_v24 = vadd.f32 %v144_v22, %v71_v20 }
 0x1c3   :  { %v212_v26 = vpop.f32.mrf.mxu1 }
 0x1c4   :  { %v218_v27 = vmul.f32 %v217_v25, %v212_v26 }
 0x1c5   :  { %v343_v28 = vpop.f32.mrf.mxu1 }
 0x1c6   :  { %v219_v29 = vadd.f32 %v218_v27, %v145_v24 }
 0x1c8   :  { %220 = vst [vmem:[#allocation9] sm:$0xff] %v219_v29 }
 0x1c9   :  { %411 = shalt.err (!%p408_p0)
}
 0x1ca   :  { %230 = dma.vmem_to_hbm [thread:$0]  %s228_s28, 128, %s507_s3, [#allocation4]  }
 0x1cb   :  { %426 = dma.done.wait [#allocation4], 128  }
 0x1cc   :  { %427 = vsyncadd [#allocation4], 4294967168 }
 0x1cd   :  { %234 = vsyncpa [#allocation3], 1 }
 0x1ce   :  { %235 = vsyncpa [#allocation8], 1 }
 0x1cf   :  { %236 = vsyncpa [#allocation4], 1 }
 0x1d0   :  { %237 = vsyncpa [#allocation5], 1 }

</bundles_post_ra>
